<compile_context>
chip_gen: v7x
topology: tpu7x:2x2x1
jax: 0.10.0
libtpu: 0.0.40
codegen_flags: <defaults>
</compile_context>

<pallas_src>
import jax
import jax.numpy as jnp
from jax.experimental import pallas as pl
from jax.experimental.pallas import tpu as pltpu


def _basic_conv_kernel(x_ref, w_ref, bias_ref, o_ref):
    # x_ref:    (NB, Cin, thw)   packed batch x spatial tile (lane-major)
    # w_ref:    (Cout, Cin)      conv weight with BN scale folded in (resident)
    # bias_ref: (Cout, 1)        folded BN bias ((conv_b - mean) * scale + beta)
    # o_ref:    (NB, Cout, thw)  lane-dense output tile
    w = w_ref[...]
    b = bias_ref[...]
    nb = x_ref.shape[0]  # static
    for i in range(nb):  # small, static, unrolled
        y = jnp.dot(w, x_ref[i], preferred_element_type=jnp.float32)
        o_ref[i] = jnp.maximum(y + b, 0.0).astype(o_ref.dtype)


def basic_conv_forward(x_nchw, params, *, tile_hw_cap=8192,
                       vmem_budget_bytes=24 * 1024 * 1024):
    """Fused 1x1 Conv2d + BatchNorm2d(eval) + ReLU.

    x_nchw: (N, Cin, H, W) float32
    params: dict with conv_w (Cout, Cin), conv_b (Cout,),
            bn_gamma, bn_beta, bn_mean, bn_var (Cout,), bn_eps (python float)
    returns: (N, Cout, H, W) float32
    """
    N, Cin, H, W = x_nchw.shape
    conv_w = params["conv_w"].astype(jnp.float32)   # (Cout, Cin)
    conv_b = params["conv_b"].astype(jnp.float32)   # (Cout,)
    gamma = params["bn_gamma"].astype(jnp.float32)
    beta = params["bn_beta"].astype(jnp.float32)
    mean = params["bn_mean"].astype(jnp.float32)
    var = params["bn_var"].astype(jnp.float32)
    eps = params["bn_eps"]
    Cout = conv_w.shape[0]

    # Fold BN into the weights / a per-channel bias (parameter glue, tiny).
    scale = gamma * jax.lax.rsqrt(var + eps)          # (Cout,)
    w_scaled = conv_w * scale[:, None]                # (Cout, Cin)
    bias = (conv_b - mean) * scale + beta             # (Cout,)
    bias_2d = bias.reshape(Cout, 1)

    HW = H * W
    itemsize = 4  # f32 streaming

    # Spatial (lane) tile from a VMEM budget: double-buffered x- and y-tiles
    # must fit in ~vmem_budget_bytes (safe on v7x's 64 MiB VMEM, well under the
    # 48 MiB scoped limit we request below; also safe on v5e/v6e).
    lanes_budget = max(128, vmem_budget_bytes // (2 * (Cin + Cout) * itemsize))
    hw_padded = pl.cdiv(HW, 128) * 128
    thw = min(hw_padded, tile_hw_cap, (lanes_budget // 128) * 128)
    thw = max(thw, 128)
    hw_tiles = pl.cdiv(HW, thw)

    # If the whole spatial extent fits in one tile, pack batch elements so each
    # grid step still moves a large payload (up to the same VMEM budget).
    if hw_tiles == 1:
        nb = max(1, min(N, lanes_budget // thw))
    else:
        nb = 1
    n_blocks = pl.cdiv(N, nb)

    # NCHW -> (N, Cin, HW): pure reshape, no HBM pass.  No padding: the grid
    # uses cdiv and Pallas masks the boundary blocks on store.
    x_flat = x_nchw.reshape(N, Cin, HW).astype(jnp.float32)

    grid = (hw_tiles, n_blocks)   # larger (spatial) axis first for core split

    flops = 2 * N * HW * Cin * Cout
    bytes_accessed = itemsize * (N * Cin * HW + Cout * Cin + Cout
                                 + N * Cout * HW)

    out_flat = pl.pallas_call(
        _basic_conv_kernel,
        out_shape=jax.ShapeDtypeStruct((N, Cout, HW), jnp.float32),
        grid_spec=pltpu.PrefetchScalarGridSpec(
            num_scalar_prefetch=0,
            grid=grid,
            in_specs=[
                # packed-batch spatial tile of the activations
                pl.BlockSpec((nb, Cin, thw), lambda j, n: (n, 0, j)),
                # full folded weight, resident across the grid
                pl.BlockSpec((Cout, Cin), lambda j, n: (0, 0)),
                # folded bias, broadcast over lanes in-kernel
                pl.BlockSpec((Cout, 1), lambda j, n: (0, 0)),
            ],
            out_specs=pl.BlockSpec((nb, Cout, thw), lambda j, n: (n, 0, j)),
        ),
        compiler_params=pltpu.CompilerParams(
            dimension_semantics=("parallel", "parallel"),
            vmem_limit_bytes=48 * 1024 * 1024,
        ),
        cost_estimate=pl.CostEstimate(
            flops=flops, transcendentals=0, bytes_accessed=bytes_accessed),
    )(x_flat, w_scaled, bias_2d)

    return out_flat.reshape(N, Cout, H, W)   # pure reshape back to NCHW


def init_params(key, channels, inter_channels):
    k1, k2, k3, k4, k5, k6 = jax.random.split(key, 6)
    return {
        # Conv2d(channels, inter_channels, kernel_size=1) -> weight (Cout, Cin)
        "conv_w": jax.random.normal(k1, (inter_channels, channels), jnp.float32) * 0.1,
        "conv_b": jax.random.normal(k2, (inter_channels,), jnp.float32) * 0.1,
        "bn_gamma": 1.0 + 0.1 * jax.random.normal(k3, (inter_channels,), jnp.float32),
        "bn_beta": 0.1 * jax.random.normal(k4, (inter_channels,), jnp.float32),
        "bn_mean": 0.1 * jax.random.normal(k5, (inter_channels,), jnp.float32),
        "bn_var": jnp.abs(1.0 + 0.1 * jax.random.normal(k6, (inter_channels,), jnp.float32)),
        "bn_eps": 1e-5,
    }


if __name__ == "__main__":
    key = jax.random.PRNGKey(0)
    kx, kp = jax.random.split(key)

    N, Cin, H, W = 2, 4, 16, 16
    Cout = 8
    x = jax.random.normal(kx, (N, Cin, H, W), jnp.float32)
    params = init_params(kp, Cin, Cout)

    out = basic_conv_forward(x, params)
    out = jax.block_until_ready(out)

    # Reference check in plain JAX (eval-mode BN).
    scale = params["bn_gamma"] / jnp.sqrt(params["bn_var"] + params["bn_eps"])
    bias = (params["conv_b"] - params["bn_mean"]) * scale + params["bn_beta"]
    ref = jnp.einsum("nchw,oc->nohw", x, params["conv_w"])
    ref = ref * scale[None, :, None, None] + bias[None, :, None, None]
    ref = jnp.maximum(ref, 0.0)
    assert out.shape == (N, Cout, H, W)
    assert jnp.allclose(out, ref, atol=1e-4, rtol=1e-4)

    print("KERNEL_OK")
</pallas_src>

<mosaic_0001>
module attributes {stable_mosaic.version = 11 : i64} {
  func.func @_basic_conv_kernel(%arg0: i32, %arg1: i32, %arg2: memref<2x4x256xf32, #tpu.memory_space<vmem>>, %arg3: memref<8x4xf32, #tpu.memory_space<vmem>>, %arg4: memref<8x1xf32, #tpu.memory_space<vmem>>, %arg5: memref<2x8x256xf32, #tpu.memory_space<vmem>>) attributes {dimension_semantics = [#tpu.dimension_semantics<parallel>, #tpu.dimension_semantics<parallel>], iteration_bounds = array<i64: 1, 1>, scalar_prefetch = 0 : i64, scratch_operands = 0 : i64, tpu.core_type = #tpu.core_type<tc>, window_params = [{transform_indices = @transform_0, window_bounds = array<i64: 2, 4, 256>}, {pipeline_mode = #tpu.pipeline_mode<synchronous>, transform_indices = @transform_1, window_bounds = array<i64: 8, 4>}, {pipeline_mode = #tpu.pipeline_mode<synchronous>, transform_indices = @transform_2, window_bounds = array<i64: 8, 1>}, {transform_indices = @transform_3, window_bounds = array<i64: 2, 8, 256>}]} {
    %c0 = arith.constant 0 : index
    %c0_0 = arith.constant 0 : index
    %0 = vector.load %arg3[%c0, %c0_0] : memref<8x4xf32, #tpu.memory_space<vmem>>, vector<8x4xf32>
    %c0_1 = arith.constant 0 : index
    %c0_2 = arith.constant 0 : index
    %1 = vector.load %arg4[%c0_1, %c0_2] : memref<8x1xf32, #tpu.memory_space<vmem>>, vector<8x1xf32>
    %c0_3 = arith.constant 0 : index
    %c0_4 = arith.constant 0 : index
    %c0_5 = arith.constant 0 : index
    %2 = vector.load %arg2[%c0_3, %c0_4, %c0_5] : memref<2x4x256xf32, #tpu.memory_space<vmem>>, vector<1x4x256xf32>
    %3 = vector.shape_cast %2 : vector<1x4x256xf32> to vector<4x256xf32>
    %cst = arith.constant dense<0.000000e+00> : vector<8x256xf32>
    %4 = tpu.matmul %0, %3, %cst {dimension_numbers = #tpu.dot_dimension_numbers<[1], [0], [0], [1], [0, 0, 1, 1], [], []>} : vector<8x4xf32>, vector<4x256xf32>, vector<8x256xf32> -> vector<8x256xf32>
    %5 = vector.broadcast %1 : vector<8x1xf32> to vector<8x256xf32>
    %6 = arith.addf %4, %5 : vector<8x256xf32>
    %cst_6 = arith.constant 0.000000e+00 : f32
    %7 = vector.broadcast %cst_6 : f32 to vector<8x256xf32>
    %8 = arith.maximumf %6, %7 : vector<8x256xf32>
    %c0_7 = arith.constant 0 : index
    %c0_8 = arith.constant 0 : index
    %c0_9 = arith.constant 0 : index
    %9 = vector.load %arg5[%c0_7, %c0_8, %c0_9] : memref<2x8x256xf32, #tpu.memory_space<vmem>>, vector<1x8x256xf32>
    %10 = vector.shape_cast %9 : vector<1x8x256xf32> to vector<8x256xf32>
    %11 = vector.shape_cast %8 : vector<8x256xf32> to vector<1x8x256xf32>
    tpu.vector_store %arg5[%c0_7, %c0_8, %c0_9], %11 {strides = array<i32>} : memref<2x8x256xf32, #tpu.memory_space<vmem>>, vector<1x8x256xf32>,
    %c1 = arith.constant 1 : index
    %c0_10 = arith.constant 0 : index
    %c0_11 = arith.constant 0 : index
    %12 = vector.load %arg2[%c1, %c0_10, %c0_11] : memref<2x4x256xf32, #tpu.memory_space<vmem>>, vector<1x4x256xf32>
    %13 = vector.shape_cast %12 : vector<1x4x256xf32> to vector<4x256xf32>
    %cst_12 = arith.constant dense<0.000000e+00> : vector<8x256xf32>
    %14 = tpu.matmul %0, %13, %cst_12 {dimension_numbers = #tpu.dot_dimension_numbers<[1], [0], [0], [1], [0, 0, 1, 1], [], []>} : vector<8x4xf32>, vector<4x256xf32>, vector<8x256xf32> -> vector<8x256xf32>
    %15 = vector.broadcast %1 : vector<8x1xf32> to vector<8x256xf32>
    %16 = arith.addf %14, %15 : vector<8x256xf32>
    %cst_13 = arith.constant 0.000000e+00 : f32
    %17 = vector.broadcast %cst_13 : f32 to vector<8x256xf32>
    %18 = arith.maximumf %16, %17 : vector<8x256xf32>
    %c1_14 = arith.constant 1 : index
    %c0_15 = arith.constant 0 : index
    %c0_16 = arith.constant 0 : index
    %19 = vector.load %arg5[%c1_14, %c0_15, %c0_16] : memref<2x8x256xf32, #tpu.memory_space<vmem>>, vector<1x8x256xf32>
    %20 = vector.shape_cast %19 : vector<1x8x256xf32> to vector<8x256xf32>
    %21 = vector.shape_cast %18 : vector<8x256xf32> to vector<1x8x256xf32>
    tpu.vector_store %arg5[%c1_14, %c0_15, %c0_16], %21 {strides = array<i32>} : memref<2x8x256xf32, #tpu.memory_space<vmem>>, vector<1x8x256xf32>,
    return
  }
  func.func @transform_0(%arg0: i32, %arg1: i32) -> (i32, i32, i32) {
    %c0_i32 = arith.constant 0 : i32
    %c0_i32_0 = arith.constant 0 : i32
    return %arg1, %c0_i32, %arg0 : i32, i32, i32
  }
  func.func @transform_1(%arg0: i32, %arg1: i32) -> (i32, i32) {
    %c0_i32 = arith.constant 0 : i32
    %c0_i32_0 = arith.constant 0 : i32
    %c0_i32_1 = arith.constant 0 : i32
    return %c0_i32, %c0_i32_0 : i32, i32
  }
  func.func @transform_2(%arg0: i32, %arg1: i32) -> (i32, i32) {
    %c0_i32 = arith.constant 0 : i32
    %c0_i32_0 = arith.constant 0 : i32
    %c0_i32_1 = arith.constant 0 : i32
    return %c0_i32, %c0_i32_0 : i32, i32
  }
  func.func @transform_3(%arg0: i32, %arg1: i32) -> (i32, i32, i32) {
    %c0_i32 = arith.constant 0 : i32
    %c0_i32_0 = arith.constant 0 : i32
    return %arg1, %c0_i32, %arg0 : i32, i32, i32
  }
}

</mosaic_0001>

<bundles_post_ra>
// kernel: tpu_custom_call.1
= control target key start
LH: loop header
LB: loop body
LE: loop exit
PB: predicated region body
PF: predicated region fallthrough
CT: control target
= control target key end

     0   :  { %vm29_vm0 = vcmask 1043456   ;;  %v248_v4 = vmov 0.0   ;;  %s301_s0 = inlined_call_operand.vmem [shape: f32[2,4,256], index: 0, kind: input, shape index: {}]   ;;  %s302_s1 = inlined_call_operand.vmem [shape: f32[8,4], index: 1, kind: input, shape index: {}]   ;;  %s303_s2 = inlined_call_operand.vmem [shape: f32[8,1], index: 2, kind: input, shape index: {}]   ;;  %s304_s3 = inlined_call_operand.hbm [shape: f32[2,8,256], index: 3, kind: output, shape index: {}]  }
   0x1   :  { %v17_v0 = vld [vmem:[%s301_s0] sm:$0xff]  ;;  %v212_v1 = vld [vmem:[%s301_s0 + $0x8] sm:$0xff]  ;;  %98 = vmatprep.mubr.f32.mxu0 %v248_v4  ;;  %181 = vmatprep.mubr.f32.mxu1 %v248_v4 }
   0x2   :  { %v24_v2 = vcombine.high %v17_v0, %v17_v0  ;;  %v112_v3 = vcombine.high %v212_v1, %v212_v1 }
   0x3   :  { %8 = vsyncpa [#allocation3], 0  ;;  %v15_v5 = vld [vmem:[%s302_s1] sm:$0xff]  ;;  %vm25_vm1 = vcmask 31744   ;;  %v249_v6 = vmov 0   ;;  %s250_s0 = smov [#allocation2]  }
   0x4   :  { %221 = vset.pattern.permute.xlu0 %v249_v6  ;;  %209 = vmatprep.subr.msk.mxu0 %vm29_vm0, %v24_v2  ;;  %v16_v7 = vld [vmem:[%s303_s2] sm:$0xff]  ;;  %s198_s1 = sshll.u32 %s250_s0, 4  ;;  %s199_s1 = int_to_ptr.vmem [resolvable:$true] %s198_s1 }
   0x5   :  { %213 = vmatprep.subr.msk.mxu1 %vm29_vm0, %v112_v3  ;;  %210 = vmatpush1.msk.msra.mxu0 %vm29_vm0, %v17_v0  ;;  %s224_s2 = scalar_lea.vmem %s199_s1, 512  ;;  %p229_p1 = scmp.lt.s32.totalorder %s199_s1, %s199_s1 }
   0x6   :  { %214 = vmatpush1.msk.msra.mxu1 %vm29_vm0, %v212_v1  ;;  %211 = vmatmul.mubr.msk.f32.vlgmr.msra.gmra.mrb[0].mxu0 %vm25_vm1, %v15_v5  ;;  %p225_p0 = scmp.ne.s32.totalorder %s199_s1, %s224_s2  ;;  %p230_p2 = scmp.lt.s32.totalorder %s224_s2, %s224_s2 }
   0x7   :  { %215 = vmatmul.mubr.msk.f32.vlgmr.msra.gmra.mrb[0].mxu1 %vm25_vm1, %v15_v5  ;;  %20 = vperm.xlu0 %221, %v16_v7  }
   0x8   :  { %p231_p3 = por %p230_p2, %p229_p1 }
   0xa   :  { %p232_p4 = pnand %p231_p3, %p225_p0 }
  0x86   :  { %v21_v8 = vpop.permute.xlu0 %20 }
  0xd9   :  { %v100_v9 = vpop.f32.mrb[0].mxu0 }
  0xda   :  { %v183_v10 = vpop.f32.mrb[0].mxu1  ;;  %v101_v11 = vadd.f32 %v100_v9, %v21_v8  ;;  %v102_v13 = vpop.f32.mrb[1].mxu0 }
  0xdb   :  { %v184_v12 = vadd.f32 %v183_v10, %v21_v8  ;;  %v185_v14 = vpop.f32.mrb[1].mxu1  ;;  %v103_v15 = vadd.f32 %v102_v13, %v21_v8 }
  0xdc   :  { %v186_v16 = vadd.f32 %v185_v14, %v21_v8  ;;  %v105_v17 = vmax.f32 %v101_v11, 0.0 }
  0xdd   :  { %v188_v18 = vmax.f32 %v184_v12, 0.0  ;;  %v106_v19 = vmax.f32 %v103_v15, 0.0 }
  0xde   :  { %v189_v20 = vmax.f32 %v186_v16, 0.0  ;;  %107 = vst [vmem:[#allocation2] sm:$0xff] %v105_v17 }
  0xdf   :  { %191 = vst [vmem:[#allocation2 + $0x10] sm:$0xff] %v188_v18  ;;  %108 = vst [vmem:[#allocation2 + $0x8] sm:$0xff] %v106_v19 }
  0xe0   :  { %192 = vst [vmem:[#allocation2 + $0x18] sm:$0xff] %v189_v20 }
  0xe1   :  { %235 = shalt.err (!%p232_p4)
}
  0xe2   :  { %s236_s22 = scalar_lea.hbm %s304_s3, 512 }
  0xe3   :  { %p237_p5 = scmp.ne.s32.totalorder %s304_s3, %s236_s22  ;;  %p240_p6 = scmp.lt.u32.totalorder %s236_s22, %s304_s3 }
  0xe5   :  { %p242_p7 = pnand %p240_p6, %p237_p5 }
  0xe7   :  { %245 = shalt.err (!%p242_p7)
}
  0xe8   :  { %s251_s27 = smov 256   ;;  %s252_s28 = smov 16  }
  0xe9   :  { %204 = dma.vmem_to_hbm [thread:$0]  %s199_s1, 512, %s304_s3, [#allocation3], %s251_s27, %s251_s27, %s252_s28  }
  0xea   :  { %246 = dma.done.wait [#allocation3], 512  }
  0xeb   :  { %247 = vsyncadd [#allocation3], 4294966784 }
  0xec   :  { %208 = vsyncpa [#allocation3], 1 }

</bundles_post_ra>
